<compile_context>
chip_gen: v7x
topology: tpu7x:2x2x1
jax: 0.10.0
libtpu: 0.0.40
codegen_flags: <defaults>
</compile_context>

<pallas_src>
import jax
import jax.numpy as jnp
from jax import lax
from jax.experimental import pallas as pl
from jax.experimental.pallas import tpu as pltpu


# ---------------------------------------------------------------------------
# Kernel
# ---------------------------------------------------------------------------
def ffn_kernel(x_ref, w1_ref, b1_ref, w2_ref, b2_ref, o_ref, acc_ref):
    """Fused Linear -> ReLU -> Linear on one (token tile, d_ff chunk) grid cell.

    x_ref  : (tm, d_model)        bf16   token tile (lane-dense features)
    w1_ref : (dff_chunk, d_model) bf16   linear1.weight chunk (PyTorch layout)
    b1_ref : (1, dff_chunk)       f32    linear1.bias chunk
    w2_ref : (d_model, dff_chunk) bf16   linear2.weight chunk (PyTorch layout)
    b2_ref : (1, d_model)         f32    linear2.bias
    o_ref  : (tm, d_model)        f32    output tile
    acc_ref: (tm, d_model)        f32    accumulator over d_ff chunks
    """
    k = pl.program_id(1)

    @pl.when(k == 0)
    def _():
        acc_ref[...] = jnp.zeros_like(acc_ref)

    x = x_ref[...]
    # linear1 on this d_ff chunk: contract the last dim of both operands
    # (== x @ w1.T), so the PyTorch weight layout feeds the MXU untransposed.
    h = lax.dot_general(
        x, w1_ref[...],
        dimension_numbers=(((1,), (1,)), ((), ())),
        preferred_element_type=jnp.float32)              # (tm, dff_chunk) f32
    h = jnp.maximum(h + b1_ref[...], 0.0)                # bias + ReLU (VPU, f32)

    # Partial linear2: contract over this d_ff chunk (== h @ w2.T chunk).
    acc_ref[...] += lax.dot_general(
        h.astype(jnp.bfloat16), w2_ref[...],
        dimension_numbers=(((1,), (1,)), ((), ())),
        preferred_element_type=jnp.float32)              # (tm, d_model) f32

    @pl.when(k == pl.num_programs(1) - 1)
    def _():
        o_ref[...] = (acc_ref[...] + b2_ref[...]).astype(o_ref.dtype)


# ---------------------------------------------------------------------------
# Tile sizing (generation-aware: v7x has 64 MiB VMEM, v5e/v6e have 128 MiB)
# ---------------------------------------------------------------------------
def _vmem_capacity_bytes():
    try:
        return int(pltpu.get_tpu_info().vmem_capacity_bytes)
    except Exception:
        return 64 * 1024 * 1024          # conservative (v7x per-TensorCore)


def _vmem_bytes(tm, chunk, d_model, nbuf_w):
    """Rough per-step VMEM footprint for the chosen tiles."""
    b = 2 * tm * d_model * 2             # x tile (bf16, double-buffered)
    b += 2 * tm * d_model * 4            # out tile (f32, double-buffered)
    b += tm * d_model * 4                # f32 accumulator scratch
    b += tm * chunk * (4 + 2)            # (tm, chunk) intermediate (f32 + bf16)
    b += nbuf_w * chunk * d_model * 2 * 2   # w1 + w2 chunks (bf16)
    b += nbuf_w * chunk * 4              # b1 chunk (f32)
    b += d_model * 4                     # b2 (f32)
    return b


def _choose_tiles(M, d_model, d_ff, budget):
    """Pick (max token tile, d_ff chunk) that fits the VMEM budget."""
    tm_cands = [t for t in (1024, 512, 256, 128, 64, 32, 16, 8) if t <= M] or [8]
    chunk_cands = [d_ff] + [c for c in (4096, 2048, 1024, 512, 256, 128)
                            if c < d_ff]
    for chunk in chunk_cands:
        nbuf_w = 1 if chunk == d_ff else 2    # invariant weights -> 1 buffer
        for tm in tm_cands:
            if _vmem_bytes(tm, chunk, d_model, nbuf_w) <= budget:
                return tm, chunk
    return 8, min(d_ff, 128)


def _choose_tm(M, max_tile):
    """8-aligned token tile, preferring one that divides M (no pad/slice pass)
    and giving >= 2 grid steps so both v7x TensorCores get work."""
    if M % 8 == 0:
        t = min(max_tile, M)
        t -= t % 8
        while t >= 8:
            if M % t == 0:
                if t == M and M >= 16 and (M // 2) % 8 == 0:
                    t = M // 2            # split a single big block in two
                return t, M
            t -= 8
    tm = max(8, min(max_tile, -(-M // 8) * 8))
    tm -= tm % 8
    tm = max(tm, 8)
    return tm, pl.cdiv(M, tm) * tm


# ---------------------------------------------------------------------------
# Wrapper
# ---------------------------------------------------------------------------
def position_wise_ffn(x, w1, b1, w2, b2):
    """x: (B, S, d_model); w1: (d_ff, d_model); b1: (d_ff,);
    w2: (d_model, d_ff); b2: (d_model,).  PyTorch nn.Linear layout."""
    B, S, d_model = x.shape
    d_ff = w1.shape[0]
    M = B * S

    cap = _vmem_capacity_bytes()
    budget = int(cap * 0.6)                          # leave compiler headroom
    max_tile, dff_chunk = _choose_tiles(M, d_model, d_ff, budget)
    tm, Mp = _choose_tm(M, max_tile)

    # bf16 operands for the MXU; biases stay f32 (added in f32 on the VPU).
    x2 = x.reshape(M, d_model).astype(jnp.bfloat16)
    if Mp != M:
        x2 = jnp.pad(x2, ((0, Mp - M), (0, 0)))
    w1b = w1.astype(jnp.bfloat16)                    # (d_ff, d_model), no transpose
    w2b = w2.astype(jnp.bfloat16)                    # (d_model, d_ff), no transpose
    b1r = b1.astype(jnp.float32).reshape(1, d_ff)
    b2r = b2.astype(jnp.float32).reshape(1, d_model)

    # Pad d_ff only if the chunk does not divide it (zero rows/cols + zero bias
    # contribute exactly zero after ReLU, so the result is unchanged).
    d_ff_p = d_ff
    if d_ff % dff_chunk != 0:
        d_ff_p = pl.cdiv(d_ff, dff_chunk) * dff_chunk
        pad = d_ff_p - d_ff
        w1b = jnp.pad(w1b, ((0, pad), (0, 0)))
        w2b = jnp.pad(w2b, ((0, 0), (0, pad)))
        b1r = jnp.pad(b1r, ((0, 0), (0, pad)))

    n_tok = Mp // tm
    n_ff = d_ff_p // dff_chunk
    nbuf_w = 1 if n_ff == 1 else 2
    needed = _vmem_bytes(tm, dff_chunk, d_model, nbuf_w)
    vmem_limit = int(min(cap * 0.9, max(2 * needed, 32 * 1024 * 1024)))

    cost = pl.CostEstimate(
        flops=4 * M * d_model * d_ff,
        transcendentals=0,
        bytes_accessed=(Mp * d_model * 2 + 2 * d_ff_p * d_model * 2
                        + Mp * d_model * 4 + d_ff_p * 4 + d_model * 4))

    def build(single_buffer_weights):
        inv = pl.Buffered(1) if single_buffer_weights else None
        w_mode = inv if n_ff == 1 else None          # chunked weights must pipeline
        return pl.pallas_call(
            ffn_kernel,
            out_shape=jax.ShapeDtypeStruct((Mp, d_model), jnp.float32),
            grid_spec=pltpu.PrefetchScalarGridSpec(
                num_scalar_prefetch=0,
                grid=(n_tok, n_ff),
                in_specs=[
                    pl.BlockSpec((tm, d_model), lambda i, k: (i, 0)),
                    pl.BlockSpec((dff_chunk, d_model), lambda i, k: (k, 0),
                                 pipeline_mode=w_mode),
                    pl.BlockSpec((1, dff_chunk), lambda i, k: (0, k),
                                 pipeline_mode=w_mode),
                    pl.BlockSpec((d_model, dff_chunk), lambda i, k: (0, k),
                                 pipeline_mode=w_mode),
                    pl.BlockSpec((1, d_model), lambda i, k: (0, 0),
                                 pipeline_mode=inv),
                ],
                out_specs=pl.BlockSpec((tm, d_model), lambda i, k: (i, 0)),
                scratch_shapes=[pltpu.VMEM((tm, d_model), jnp.float32)],
            ),
            compiler_params=pltpu.CompilerParams(
                dimension_semantics=("parallel", "arbitrary"),
                vmem_limit_bytes=vmem_limit),
            cost_estimate=cost,
        )

    try:
        out = jax.block_until_ready(
            build(single_buffer_weights=True)(x2, w1b, b1r, w2b, b2r))
    except Exception:
        # Older JAX may reject pl.Buffered(1); default double-buffering is
        # still correct, just uses a bit more VMEM for invariant blocks.
        out = build(single_buffer_weights=False)(x2, w1b, b1r, w2b, b2r)

    if Mp != M:
        out = out[:M]
    return out.reshape(B, S, d_model)


# ---------------------------------------------------------------------------
# Reference + test
# ---------------------------------------------------------------------------
def reference(x, w1, b1, w2, b2):
    """Pure-JAX reproduction of PositionWiseFeedForward.forward."""
    h = jax.nn.relu(jnp.einsum("bsd,fd->bsf", x, w1) + b1)
    return jnp.einsum("bsf,df->bsd", h, w2) + b2


if __name__ == "__main__":
    B, S, d_model, d_ff = 2, 8, 32, 64

    key = jax.random.PRNGKey(0)
    kx, k1, kb1, k2, kb2 = jax.random.split(key, 5)
    x = jax.random.normal(kx, (B, S, d_model), dtype=jnp.float32)
    w1 = 0.1 * jax.random.normal(k1, (d_ff, d_model), dtype=jnp.float32)   # linear1.weight
    b1 = 0.1 * jax.random.normal(kb1, (d_ff,), dtype=jnp.float32)          # linear1.bias
    w2 = 0.1 * jax.random.normal(k2, (d_model, d_ff), dtype=jnp.float32)   # linear2.weight
    b2 = 0.1 * jax.random.normal(kb2, (d_model,), dtype=jnp.float32)       # linear2.bias

    out = position_wise_ffn(x, w1, b1, w2, b2)
    out = jax.block_until_ready(out)
    ref = reference(x, w1, b1, w2, b2)

    assert out.shape == (B, S, d_model), out.shape
    # bf16 MXU operands -> loosened tolerance vs the f32 reference.
    err = float(jnp.max(jnp.abs(out - ref)))
    assert jnp.allclose(out, ref, atol=2e-2, rtol=2e-2), err
    print("KERNEL_OK")
</pallas_src>

<mosaic_0001>
module attributes {stable_mosaic.version = 11 : i64} {
  func.func @ffn_kernel(%arg0: i32, %arg1: i32, %arg2: memref<8x32xbf16, #tpu.memory_space<vmem>>, %arg3: memref<64x32xbf16, #tpu.memory_space<vmem>>, %arg4: memref<1x64xf32, #tpu.memory_space<vmem>>, %arg5: memref<32x64xbf16, #tpu.memory_space<vmem>>, %arg6: memref<1x32xf32, #tpu.memory_space<vmem>>, %arg7: memref<8x32xf32, #tpu.memory_space<vmem>>, %arg8: memref<8x32xf32, #tpu.memory_space<vmem>>) attributes {dimension_semantics = [#tpu.dimension_semantics<parallel>, #tpu.dimension_semantics<arbitrary>], iteration_bounds = array<i64: 2, 1>, scalar_prefetch = 0 : i64, scratch_operands = 1 : i64, tpu.core_type = #tpu.core_type<tc>, window_params = [{transform_indices = @transform_0, window_bounds = array<i64: 8, 32>}, {pipeline_mode = #tpu.pipeline_mode<synchronous>, transform_indices = @transform_1, window_bounds = array<i64: 64, 32>}, {pipeline_mode = #tpu.pipeline_mode<synchronous>, transform_indices = @transform_2, window_bounds = array<i64: 1, 64>}, {pipeline_mode = #tpu.pipeline_mode<synchronous>, transform_indices = @transform_3, window_bounds = array<i64: 32, 64>}, {pipeline_mode = #tpu.pipeline_mode<synchronous>, transform_indices = @transform_4, window_bounds = array<i64: 1, 32>}, {transform_indices = @transform_5, window_bounds = array<i64: 8, 32>}]} {
    %c0_i32 = arith.constant 0 : i32
    %0 = arith.cmpi eq, %arg1, %c0_i32 : i32
    %1 = arith.extui %0 : i1 to i32
    %c0_i32_0 = arith.constant 0 : i32
    %2 = arith.cmpi ne, %1, %c0_i32_0 : i32
    scf.if %2 {
      %cst_16 = arith.constant 0.000000e+00 : f32
      %20 = vector.broadcast %cst_16 : f32 to vector<8x32xf32>
      %c0_17 = arith.constant 0 : index
      %c0_18 = arith.constant 0 : index
      %21 = vector.load %arg8[%c0_17, %c0_18] : memref<8x32xf32, #tpu.memory_space<vmem>>, vector<8x32xf32>
      tpu.vector_store %arg8[%c0_17, %c0_18], %20 {strides = array<i32>} : memref<8x32xf32, #tpu.memory_space<vmem>>, vector<8x32xf32>,
    } else {
    }
    %c0 = arith.constant 0 : index
    %c0_1 = arith.constant 0 : index
    %3 = vector.load %arg2[%c0, %c0_1] : memref<8x32xbf16, #tpu.memory_space<vmem>>, vector<8x32xbf16>
    %c0_2 = arith.constant 0 : index
    %c0_3 = arith.constant 0 : index
    %4 = vector.load %arg3[%c0_2, %c0_3] : memref<64x32xbf16, #tpu.memory_space<vmem>>, vector<64x32xbf16>
    %cst = arith.constant dense<0.000000e+00> : vector<8x64xf32>
    %5 = tpu.matmul %3, %4, %cst {dimension_numbers = #tpu.dot_dimension_numbers<[1], [1], [0], [0], [0, 0, 1, 0], [], []>} : vector<8x32xbf16>, vector<64x32xbf16>, vector<8x64xf32> -> vector<8x64xf32>
    %c0_4 = arith.constant 0 : index
    %c0_5 = arith.constant 0 : index
    %6 = vector.load %arg4[%c0_4, %c0_5] : memref<1x64xf32, #tpu.memory_space<vmem>>, vector<1x64xf32>
    %7 = vector.broadcast %6 : vector<1x64xf32> to vector<8x64xf32>
    %8 = arith.addf %5, %7 : vector<8x64xf32>
    %cst_6 = arith.constant 0.000000e+00 : f32
    %9 = vector.broadcast %cst_6 : f32 to vector<8x64xf32>
    %10 = arith.maximumf %8, %9 : vector<8x64xf32>
    %c0_7 = arith.constant 0 : index
    %c0_8 = arith.constant 0 : index
    %11 = vector.load %arg8[%c0_7, %c0_8] : memref<8x32xf32, #tpu.memory_space<vmem>>, vector<8x32xf32>
    %12 = arith.truncf %10 : vector<8x64xf32> to vector<8x64xbf16>
    %c0_9 = arith.constant 0 : index
    %c0_10 = arith.constant 0 : index
    %13 = vector.load %arg5[%c0_9, %c0_10] : memref<32x64xbf16, #tpu.memory_space<vmem>>, vector<32x64xbf16>
    %cst_11 = arith.constant dense<0.000000e+00> : vector<8x32xf32>
    %14 = tpu.matmul %12, %13, %cst_11 {dimension_numbers = #tpu.dot_dimension_numbers<[1], [1], [0], [0], [0, 0, 1, 0], [], []>} : vector<8x64xbf16>, vector<32x64xbf16>, vector<8x32xf32> -> vector<8x32xf32>
    %15 = arith.addf %11, %14 : vector<8x32xf32>
    %c0_12 = arith.constant 0 : index
    %c0_13 = arith.constant 0 : index
    %16 = vector.load %arg8[%c0_12, %c0_13] : memref<8x32xf32, #tpu.memory_space<vmem>>, vector<8x32xf32>
    tpu.vector_store %arg8[%c0_12, %c0_13], %15 {strides = array<i32>} : memref<8x32xf32, #tpu.memory_space<vmem>>, vector<8x32xf32>,
    %c0_i32_14 = arith.constant 0 : i32
    %17 = arith.cmpi eq, %arg1, %c0_i32_14 : i32
    %18 = arith.extui %17 : i1 to i32
    %c0_i32_15 = arith.constant 0 : i32
    %19 = arith.cmpi ne, %18, %c0_i32_15 : i32
    scf.if %19 {
      %c0_16 = arith.constant 0 : index
      %c0_17 = arith.constant 0 : index
      %20 = vector.load %arg8[%c0_16, %c0_17] : memref<8x32xf32, #tpu.memory_space<vmem>>, vector<8x32xf32>
      %c0_18 = arith.constant 0 : index
      %c0_19 = arith.constant 0 : index
      %21 = vector.load %arg6[%c0_18, %c0_19] : memref<1x32xf32, #tpu.memory_space<vmem>>, vector<1x32xf32>
      %22 = vector.broadcast %21 : vector<1x32xf32> to vector<8x32xf32>
      %23 = arith.addf %20, %22 : vector<8x32xf32>
      %c0_20 = arith.constant 0 : index
      %c0_21 = arith.constant 0 : index
      %24 = vector.load %arg7[%c0_20, %c0_21] : memref<8x32xf32, #tpu.memory_space<vmem>>, vector<8x32xf32>
      tpu.vector_store %arg7[%c0_20, %c0_21], %23 {strides = array<i32>} : memref<8x32xf32, #tpu.memory_space<vmem>>, vector<8x32xf32>,
    } else {
    }
    return
  }
  func.func @transform_0(%arg0: i32, %arg1: i32) -> (i32, i32) {
    %c0_i32 = arith.constant 0 : i32
    %c0_i32_0 = arith.constant 0 : i32
    return %arg0, %c0_i32 : i32, i32
  }
  func.func @transform_1(%arg0: i32, %arg1: i32) -> (i32, i32) {
    %c0_i32 = arith.constant 0 : i32
    %c0_i32_0 = arith.constant 0 : i32
    return %arg1, %c0_i32 : i32, i32
  }
  func.func @transform_2(%arg0: i32, %arg1: i32) -> (i32, i32) {
    %c0_i32 = arith.constant 0 : i32
    %c0_i32_0 = arith.constant 0 : i32
    return %c0_i32, %arg1 : i32, i32
  }
  func.func @transform_3(%arg0: i32, %arg1: i32) -> (i32, i32) {
    %c0_i32 = arith.constant 0 : i32
    %c0_i32_0 = arith.constant 0 : i32
    return %c0_i32, %arg1 : i32, i32
  }
  func.func @transform_4(%arg0: i32, %arg1: i32) -> (i32, i32) {
    %c0_i32 = arith.constant 0 : i32
    %c0_i32_0 = arith.constant 0 : i32
    %c0_i32_1 = arith.constant 0 : i32
    return %c0_i32, %c0_i32_0 : i32, i32
  }
  func.func @transform_5(%arg0: i32, %arg1: i32) -> (i32, i32) {
    %c0_i32 = arith.constant 0 : i32
    %c0_i32_0 = arith.constant 0 : i32
    return %arg0, %c0_i32 : i32, i32
  }
}

module attributes {stable_mosaic.version = 11 : i64} {
  func.func @ffn_kernel(%arg0: i32, %arg1: i32, %arg2: memref<8x32xbf16, #tpu.memory_space<vmem>>, %arg3: memref<64x32xbf16, #tpu.memory_space<vmem>>, %arg4: memref<1x64xf32, #tpu.memory_space<vmem>>, %arg5: memref<32x64xbf16, #tpu.memory_space<vmem>>, %arg6: memref<1x32xf32, #tpu.memory_space<vmem>>, %arg7: memref<8x32xf32, #tpu.memory_space<vmem>>, %arg8: memref<8x32xf32, #tpu.memory_space<vmem>>) attributes {dimension_semantics = [#tpu.dimension_semantics<parallel>, #tpu.dimension_semantics<arbitrary>], iteration_bounds = array<i64: 2, 1>, scalar_prefetch = 0 : i64, scratch_operands = 1 : i64, tpu.core_type = #tpu.core_type<tc>, window_params = [{transform_indices = @transform_0, window_bounds = array<i64: 8, 32>}, {transform_indices = @transform_1, window_bounds = array<i64: 64, 32>}, {transform_indices = @transform_2, window_bounds = array<i64: 1, 64>}, {transform_indices = @transform_3, window_bounds = array<i64: 32, 64>}, {pipeline_mode = #tpu.pipeline_mode<synchronous>, transform_indices = @transform_4, window_bounds = array<i64: 1, 32>}, {transform_indices = @transform_5, window_bounds = array<i64: 8, 32>}]} {
    %c0_i32 = arith.constant 0 : i32
    %0 = arith.cmpi eq, %arg1, %c0_i32 : i32
    %1 = arith.extui %0 : i1 to i32
    %c0_i32_0 = arith.constant 0 : i32
    %2 = arith.cmpi ne, %1, %c0_i32_0 : i32
    scf.if %2 {
      %cst_16 = arith.constant 0.000000e+00 : f32
      %20 = vector.broadcast %cst_16 : f32 to vector<8x32xf32>
      %c0_17 = arith.constant 0 : index
      %c0_18 = arith.constant 0 : index
      %21 = vector.load %arg8[%c0_17, %c0_18] : memref<8x32xf32, #tpu.memory_space<vmem>>, vector<8x32xf32>
      tpu.vector_store %arg8[%c0_17, %c0_18], %20 {strides = array<i32>} : memref<8x32xf32, #tpu.memory_space<vmem>>, vector<8x32xf32>,
    } else {
    }
    %c0 = arith.constant 0 : index
    %c0_1 = arith.constant 0 : index
    %3 = vector.load %arg2[%c0, %c0_1] : memref<8x32xbf16, #tpu.memory_space<vmem>>, vector<8x32xbf16>
    %c0_2 = arith.constant 0 : index
    %c0_3 = arith.constant 0 : index
    %4 = vector.load %arg3[%c0_2, %c0_3] : memref<64x32xbf16, #tpu.memory_space<vmem>>, vector<64x32xbf16>
    %cst = arith.constant dense<0.000000e+00> : vector<8x64xf32>
    %5 = tpu.matmul %3, %4, %cst {dimension_numbers = #tpu.dot_dimension_numbers<[1], [1], [0], [0], [0, 0, 1, 0], [], []>} : vector<8x32xbf16>, vector<64x32xbf16>, vector<8x64xf32> -> vector<8x64xf32>
    %c0_4 = arith.constant 0 : index
    %c0_5 = arith.constant 0 : index
    %6 = vector.load %arg4[%c0_4, %c0_5] : memref<1x64xf32, #tpu.memory_space<vmem>>, vector<1x64xf32>
    %7 = vector.broadcast %6 : vector<1x64xf32> to vector<8x64xf32>
    %8 = arith.addf %5, %7 : vector<8x64xf32>
    %cst_6 = arith.constant 0.000000e+00 : f32
    %9 = vector.broadcast %cst_6 : f32 to vector<8x64xf32>
    %10 = arith.maximumf %8, %9 : vector<8x64xf32>
    %c0_7 = arith.constant 0 : index
    %c0_8 = arith.constant 0 : index
    %11 = vector.load %arg8[%c0_7, %c0_8] : memref<8x32xf32, #tpu.memory_space<vmem>>, vector<8x32xf32>
    %12 = arith.truncf %10 : vector<8x64xf32> to vector<8x64xbf16>
    %c0_9 = arith.constant 0 : index
    %c0_10 = arith.constant 0 : index
    %13 = vector.load %arg5[%c0_9, %c0_10] : memref<32x64xbf16, #tpu.memory_space<vmem>>, vector<32x64xbf16>
    %cst_11 = arith.constant dense<0.000000e+00> : vector<8x32xf32>
    %14 = tpu.matmul %12, %13, %cst_11 {dimension_numbers = #tpu.dot_dimension_numbers<[1], [1], [0], [0], [0, 0, 1, 0], [], []>} : vector<8x64xbf16>, vector<32x64xbf16>, vector<8x32xf32> -> vector<8x32xf32>
    %15 = arith.addf %11, %14 : vector<8x32xf32>
    %c0_12 = arith.constant 0 : index
    %c0_13 = arith.constant 0 : index
    %16 = vector.load %arg8[%c0_12, %c0_13] : memref<8x32xf32, #tpu.memory_space<vmem>>, vector<8x32xf32>
    tpu.vector_store %arg8[%c0_12, %c0_13], %15 {strides = array<i32>} : memref<8x32xf32, #tpu.memory_space<vmem>>, vector<8x32xf32>,
    %c0_i32_14 = arith.constant 0 : i32
    %17 = arith.cmpi eq, %arg1, %c0_i32_14 : i32
    %18 = arith.extui %17 : i1 to i32
    %c0_i32_15 = arith.constant 0 : i32
    %19 = arith.cmpi ne, %18, %c0_i32_15 : i32
    scf.if %19 {
      %c0_16 = arith.constant 0 : index
      %c0_17 = arith.constant 0 : index
      %20 = vector.load %arg8[%c0_16, %c0_17] : memref<8x32xf32, #tpu.memory_space<vmem>>, vector<8x32xf32>
      %c0_18 = arith.constant 0 : index
      %c0_19 = arith.constant 0 : index
      %21 = vector.load %arg6[%c0_18, %c0_19] : memref<1x32xf32, #tpu.memory_space<vmem>>, vector<1x32xf32>
      %22 = vector.broadcast %21 : vector<1x32xf32> to vector<8x32xf32>
      %23 = arith.addf %20, %22 : vector<8x32xf32>
      %c0_20 = arith.constant 0 : index
      %c0_21 = arith.constant 0 : index
      %24 = vector.load %arg7[%c0_20, %c0_21] : memref<8x32xf32, #tpu.memory_space<vmem>>, vector<8x32xf32>
      tpu.vector_store %arg7[%c0_20, %c0_21], %23 {strides = array<i32>} : memref<8x32xf32, #tpu.memory_space<vmem>>, vector<8x32xf32>,
    } else {
    }
    return
  }
  func.func @transform_0(%arg0: i32, %arg1: i32) -> (i32, i32) {
    %c0_i32 = arith.constant 0 : i32
    %c0_i32_0 = arith.constant 0 : i32
    return %arg0, %c0_i32 : i32, i32
  }
  func.func @transform_1(%arg0: i32, %arg1: i32) -> (i32, i32) {
    %c0_i32 = arith.constant 0 : i32
    %c0_i32_0 = arith.constant 0 : i32
    return %arg1, %c0_i32 : i32, i32
  }
  func.func @transform_2(%arg0: i32, %arg1: i32) -> (i32, i32) {
    %c0_i32 = arith.constant 0 : i32
    %c0_i32_0 = arith.constant 0 : i32
    return %c0_i32, %arg1 : i32, i32
  }
  func.func @transform_3(%arg0: i32, %arg1: i32) -> (i32, i32) {
    %c0_i32 = arith.constant 0 : i32
    %c0_i32_0 = arith.constant 0 : i32
    return %c0_i32, %arg1 : i32, i32
  }
  func.func @transform_4(%arg0: i32, %arg1: i32) -> (i32, i32) {
    %c0_i32 = arith.constant 0 : i32
    %c0_i32_0 = arith.constant 0 : i32
    %c0_i32_1 = arith.constant 0 : i32
    return %c0_i32, %c0_i32_0 : i32, i32
  }
  func.func @transform_5(%arg0: i32, %arg1: i32) -> (i32, i32) {
    %c0_i32 = arith.constant 0 : i32
    %c0_i32_0 = arith.constant 0 : i32
    return %arg0, %c0_i32 : i32, i32
  }
}

</mosaic_0001>

<bundles_post_ra>
// kernel: tpu_custom_call.1
= control target key start
LH: loop header
LB: loop body
LE: loop exit
PB: predicated region body
PF: predicated region fallthrough
CT: control target
= control target key end

     0   :  { %10 = vsyncpa [#allocation4], 0  ;;  %s964_s0 = inlined_call_operand.vmem [shape: bf16[16,32], index: 0, kind: input, shape index: {}]   ;;  %s965_s1 = inlined_call_operand.vmem [shape: bf16[64,32], index: 1, kind: input, shape index: {}]   ;;  %s966_s2 = inlined_call_operand.vmem [shape: f32[1,64], index: 2, kind: input, shape index: {}]   ;;  %s967_s3 = inlined_call_operand.vmem [shape: bf16[32,64], index: 3, kind: input, shape index: {}]   ;;  %s968_s4 = inlined_call_operand.vmem [shape: f32[1,32], index: 4, kind: input, shape index: {}]   ;;  %s969_s5 = inlined_call_operand.hbm [shape: f32[16,32], index: 5, kind: output, shape index: {}]  }
   0x1   :  { %12 = vsyncpa [#allocation4 + $0x1], 0  ;;  %s817_s18 = smov 0   ;;  %s819_s19 = smov 0  }
   0x2   :  { %s821_s20 = smov 0   ;;  %s823_s21 = smov 0  }
   0x3   :  { %s825_s22 = smov 0   ;;  %s827_s23 = smov 0  }
   0x4 LB: > { %s589_s24 = sadd.s32 4294967295, %s782_s23   ;;  %s590_s25 = sadd.s32 4294967294, %s782_s23   ;;  %s782_s23 = sphi %s827_s23, %s18_s23   ;;  %s778_s22 = sphi %s825_s22, %s976_s22   ;;  %s774_s21 = sphi %s823_s21, %s975_s21   ;;  %s770_s20 = sphi %s821_s20, %s974_s20   ;;  %s766_s19 = sphi %s819_s19, %s973_s19   ;;  %s762_s18 = sphi %s817_s18, %s972_s18  }
   0x5   : > { %s30_s26 = sadd.s32 1, %s778_s22  ;;  %s162_s27 = sadd.s32 1, %s770_s20 }
   0x6   : > { %p32_p0 = scmp.ge.s32.totalorder %s30_s26, 2  ;;  %p172_p1 = scmp.ne.s32.totalorder %s770_s20, %s766_s19 }
   0x7   : > { %p173_p2 = scmp.eq.s32.totalorder %s589_s24, 1  ;;  %p178_p3 = scmp.ne.s32.totalorder %s766_s19, %s762_s18 }
   0x8   : > { %s978_s26 = smov (%p32_p0, %s30_s26), 0  ;;  %p179_p5 = scmp.eq.s32.totalorder %s590_s25, 1 }
   0x9   : > { %p857_p4 = por %p173_p2, %p172_p1  ;;  %s159_s29 = ssub.s32 %s778_s22, %s978_s26 }
   0xa   : > { %p596_p6 = scmp.ge.s32.totalorder %s782_s23, 1  ;;  %p160_p7 = scmp.eq.s32.totalorder %s159_s29, 0 }
   0xb   : > { %p864_p8 = por %p179_p5, %p178_p3  ;;  %p229_p9 = scmp.lt.s32.totalorder %s782_s23, 3 }
   0xc   : > { %s870_s6 = scalar_select %p160_p7, %s770_s20, %s162_s27  }
   0xd   : > { %p230_p10 = pnand %p596_p6, %p229_p9 }
   0xe   : > { %vm290_vm0 = vcmask (!%p230_p10), 261120   ;;  %v784_v0 = vmov (!%p230_p10), 0.0   ;;  %v698_v1 = vld [vmem:[%s965_s1] sm:$0xff] (!%p230_p10)   ;;  %vm785_vm1 = vmmov (!%p230_p10), 0   ;;  %v699_v4 = vld [vmem:[%s965_s1 + $0x8] sm:$0xff] (!%p230_p10)   ;;  %vm401_vm2 = vcmask (!%p230_p10), 523264  }
   0xf   : > { %233 = sbr.rel (%p230_p10) target bundleno = 504 (0x1f8), region = 40  ;;  %621 = vmatprep.subr.bf16.mxu0 (!%p230_p10), %v784_v0  ;;  %291 = vst.msk [vmem:[#allocation2] sm:$0xff] (!%p230_p10), %vm290_vm0, %v784_v0  ;;  %633 = vmatprep.subr.bf16.mxu1 (!%p230_p10), %v784_v0  ;;  %v333_v2 = vsel (!%p230_p10), %vm290_vm0, %v698_v1, 0  ;;  %v702_v3 = vld [vmem:[%s967_s3] sm:$0xff] (!%p230_p10)   ;;  %v336_v6 = vsel (!%p230_p10), %vm290_vm0, %v699_v4, 0  ;;  %v700_v7 = vld [vmem:[%s965_s1 + $0x10] sm:$0xff] (!%p230_p10)  }
  0x10   : > { %629 = vmatprep.mubr.msk.bf16.mxu0 (!%p230_p10), %vm785_vm1, %v784_v0  ;;  %637 = vmatprep.mubr.msk.bf16.mxu1 (!%p230_p10), %vm785_vm1, %v784_v0  ;;  %v406_v5 = vsel (!%p230_p10), %vm401_vm2, %v702_v3, 0  ;;  %v339_v8 = vsel (!%p230_p10), %vm290_vm0, %v700_v7, 0  ;;  %p268_p11 = scmp.lt.s32.totalorder (!%p230_p10), %s774_s21, 1  ;;  %v701_v9 = vld [vmem:[%s965_s1 + $0x18] sm:$0xff] (!%p230_p10)   ;;  %v703_v12 = vld [vmem:[%s967_s3 + $0x8] sm:$0xff] (!%p230_p10)   ;;  %s265_s11 = sand.u32 (!%p230_p10), 1, %s766_s19  }
  0x11   : > { %622 = vmatpush3.bf16.xpose.msra.mxu0 (!%p230_p10), %v333_v2  ;;  %634 = vmatpush3.bf16.xpose.msra.mxu1 (!%p230_p10), %v406_v5  ;;  %v342_v10 = vsel (!%p230_p10), %vm290_vm0, %v701_v9, 0  ;;  %v409_v13 = vsel (!%p230_p10), %vm401_vm2, %v703_v12, 0  ;;  %v599_v14 = vld [vmem:[%s966_s2] ss:$0 sm:$0xff] (!%p230_p10)  ;;  %s597_s12 = sshll.u32 (!%p230_p10), %s265_s11, 3  ;;  %s610_s15 = sshll.u32 (!%p230_p10), %s774_s21, 7 }
  0x12   : > { %623 = vmatprep.subr.bf16.mxu0 (!%p230_p10), %v784_v0  ;;  %635 = vmatprep.subr.bf16.mxu1 (!%p230_p10), %v784_v0  ;;  %v608_v28 = vld [vmem:[%s968_s4] ss:$0 sm:$0xff] (!%p230_p10)  ;;  %s267_s16 = scalar_lea.vmem (!%p230_p10), [#allocation3], %s597_s12  ;;  %s916_s27 = scalar_lea.hbm (!%p230_p10), %s969_s5, %s610_s15 }
  0x16   : > { %s269_s17 = scalar_select %p268_p11, %s774_s21, 1  ;;  %v385_v22 = vld [vmem:[#allocation2] sm:$0xff] }
  0x17   : > { %s786_s21 = smov [#allocation3]  }
  0x18   : > { %s598_s24 = sshll.u32 %s269_s17, 2  ;;  %s480_s17 = sshll.u32 %s267_s16, 4  ;;  %s918_s17 = int_to_ptr.vmem [resolvable:$true] %s480_s17 }
  0x19   : > { %624 = vmatpush3.bf16.xpose.msra.mxu0 %v336_v6  ;;  %s271_s29 = scalar_lea.vmem %s964_s0, %s598_s24  ;;  %636 = vmatpush3.bf16.xpose.msra.mxu1 %v409_v13  ;;  %s704_s7 = scalar_lea.vmem %s918_s17, 128 }
  0x1a   : > { %625 = vmatprep.subr.bf16.mxu0 %v784_v0  ;;  %v292_v11 = vld [vmem:[%s271_s29] sm:$0xf]  ;;  %s467_s29 = scalar_lea.sflag [#allocation4], %s265_s11  ;;  %p705_p12 = scmp.ne.s32.totalorder %s918_s17, %s704_s7 }
  0x1b   : > { %s708_s8 = sshll.u32 %s786_s21, 4  ;;  %s709_s8 = int_to_ptr.vmem [resolvable:$false] %s708_s8 }
  0x1c   : > { %p706_p13 = pnand %p705_p12, %p857_p4  ;;  %s710_s9 = scalar_lea.vmem %s709_s8, 256 }
  0x1d   : > { %p711_p1 = scmp.lt.s32.totalorder %s918_s17, %s709_s8  ;;  %p712_p2 = scmp.lt.s32.totalorder %s710_s9, %s704_s7 }
  0x1e   : > { %p707_p0 = pneg %p706_p13 }
  0x1f   : > { %p713_p3 = por %p712_p2, %p711_p1 }
  0x21   : > { %626 = vmatpush3.bf16.xpose.msra.mxu0 %v339_v8  ;;  %p714_p5 = pnand %p713_p3, %p707_p0 }
  0x22   : > { %627 = vmatprep.subr.bf16.mxu0 %v784_v0 }
  0x29   : > { %628 = vmatpush3.bf16.xpose.msra.mxu0 %v342_v10 }
  0x30   : > { %630 = vmatmul.mubr.msk.bf16.vlgmr.msra.gmra.mrb[0].mxu0 %vm290_vm0, %v292_v11 }
 0x103   : > { %v378_v15 = vpop.f32.mrb[0].mxu0 }
 0x104   : > { %v379_v16 = vadd.f32 %v599_v14, %v378_v15  ;;  %v631_v17 = vpop.f32.mrb[1].mxu0 }
 0x105   : > { %v381_v18 = vpop.f32.mrb[2].mxu0 }
 0x106   : > { %v384_v19 = vmax.f32 %v379_v16, 0.0  ;;  %v632_v20 = vpop.f32.mrb[3].mxu0 }
 0x108   : > { %v386_v21 = vpack.c.bf16 %v384_v19, %v384_v19 }
 0x10a   : > { %638 = vmatmul.mubr.msk.bf16.vlgmr.msra.gmra.mrb[0].mxu1 %vm401_vm2, %v386_v21 }
 0x1dd   : > { %v445_v23 = vpop.f32.mrb[0].mxu1 }
 0x1de   : > { %v451_v24 = vadd.f32 %v445_v23, %v385_v22  ;;  %v639_v25 = vpop.f32.mrb[1].mxu1 }
 0x1df   : > { %v448_v26 = vpop.f32.mrb[2].mxu1 }
 0x1e0   : > { %452 = vst.msk [vmem:[#allocation2] sm:$0xff] %vm290_vm0, %v451_v24  ;;  %v640_v27 = vpop.f32.mrb[3].mxu1 }
 0x1e7   : > { %v456_v29 = vld [vmem:[#allocation2] sm:$0xff] }
 0x1e8   : > { %v464_v30 = vadd.f32 %v608_v28, %v456_v29 }
 0x1ea   : > { %465 = vst.msk [vmem:[%s267_s16] sm:$0xff] %vm290_vm0, %v464_v30 }
 0x1eb   : > { %717 = shalt.err (!%p714_p5)
}
 0x1ec   : > { %s718_s10 = scalar_lea.hbm %s916_s27, 128  ;;  %s722_s13 = scalar_lea.hbm %s969_s5, 256 }
 0x1ed   : > { %p719_p6 = scmp.ne.s32.totalorder %s916_s27, %s718_s10  ;;  %p723_p10 = scmp.lt.u32.totalorder %s916_s27, %s969_s5 }
 0x1ee   : > { %p724_p11 = scmp.lt.u32.totalorder %s722_s13, %s718_s10  ;;  %p726_p13 = scmp.lt.u32.totalorder %s718_s10, %s916_s27 }
 0x1ef   : > { %p720_p7 = pnand %p719_p6, %p857_p4 }
 0x1f0   : > { %p725_p12 = por %p724_p11, %p723_p10 }
 0x1f1   : > { %p721_p9 = pneg %p720_p7 }
 0x1f2   : > { %p727_p0 = por %p726_p13, %p725_p12 }
 0x1f4   : > { %p728_p1 = pnand %p727_p0, %p721_p9 }
 0x1f6   : > { %731 = shalt.err (!%p728_p1)
}
 0x1f7   : > { %641 = dma.vmem_to_hbm [thread:$0]  (%p857_p4), %s918_s17, 128, %s916_s27, %s467_s29  }
 0x1f8 PF: > { %p647_p2 = scmp.ge.s32.totalorder %s782_s23, 2  ;;  %s492_s16 = sand.u32 1, %s762_s18  }
 0x1f9   : > { %s493_s24 = scalar_lea.sflag [#allocation4], %s492_s16 }
 0x1fa   : > { %p644_p3 = pnand %p647_p2, %p864_p8 }
 0x1fc   : > { %757 = dma.done.wait (!%p644_p3), %s493_s24, 128  }
 0x1fd   : > { %759 = vsyncadd (!%p644_p3), %s493_s24, 4294967168  ;;  %s18_s23 = sadd.s32 1, %s782_s23   ;;  %s972_s18 = smov %s766_s19 }
 0x1fe   : > { %p15_p5 = scmp.ge.s32.totalorder %s18_s23, 4   ;;  %s973_s19 = smov %s770_s20 }
 0x1ff   : > { %s974_s20 = smov %s870_s6  ;;  %s975_s21 = smov %s778_s22 }
 0x200   : > { %s976_s22 = smov %s978_s26  ;;  %17 = sbr.rel (!%p15_p5) target bundleno = 4 (0x4), region = 92 }
 0x207   :  { %498 = vsyncpa [#allocation4], 1 }
 0x208   :  { %500 = vsyncpa [#allocation4 + $0x1], 1 }

// kernel: tpu_custom_call.1
= control target key start
LH: loop header
LB: loop body
LE: loop exit
PB: predicated region body
PF: predicated region fallthrough
CT: control target
= control target key end

     0   :  { %10 = vsyncpa [#allocation4], 0  ;;  %s964_s0 = inlined_call_operand.vmem [shape: bf16[16,32], index: 0, kind: input, shape index: {}]   ;;  %s965_s1 = inlined_call_operand.vmem [shape: bf16[64,32], index: 1, kind: input, shape index: {}]   ;;  %s966_s2 = inlined_call_operand.vmem [shape: f32[1,64], index: 2, kind: input, shape index: {}]   ;;  %s967_s3 = inlined_call_operand.vmem [shape: bf16[32,64], index: 3, kind: input, shape index: {}]   ;;  %s968_s4 = inlined_call_operand.vmem [shape: f32[1,32], index: 4, kind: input, shape index: {}]   ;;  %s969_s5 = inlined_call_operand.hbm [shape: f32[16,32], index: 5, kind: output, shape index: {}]  }
   0x1   :  { %12 = vsyncpa [#allocation4 + $0x1], 0  ;;  %s817_s18 = smov 0   ;;  %s819_s19 = smov 0  }
   0x2   :  { %s821_s20 = smov 0   ;;  %s823_s21 = smov 0  }
   0x3   :  { %s825_s22 = smov 0   ;;  %s827_s23 = smov 0  }
   0x4 LB: > { %s589_s24 = sadd.s32 4294967295, %s782_s23   ;;  %s590_s25 = sadd.s32 4294967294, %s782_s23   ;;  %s782_s23 = sphi %s827_s23, %s18_s23   ;;  %s778_s22 = sphi %s825_s22, %s976_s22   ;;  %s774_s21 = sphi %s823_s21, %s975_s21   ;;  %s770_s20 = sphi %s821_s20, %s974_s20   ;;  %s766_s19 = sphi %s819_s19, %s973_s19   ;;  %s762_s18 = sphi %s817_s18, %s972_s18  }
   0x5   : > { %s30_s26 = sadd.s32 1, %s778_s22  ;;  %s162_s27 = sadd.s32 1, %s770_s20 }
   0x6   : > { %p32_p0 = scmp.ge.s32.totalorder %s30_s26, 2  ;;  %p172_p1 = scmp.ne.s32.totalorder %s770_s20, %s766_s19 }
   0x7   : > { %p173_p2 = scmp.eq.s32.totalorder %s589_s24, 1  ;;  %p178_p3 = scmp.ne.s32.totalorder %s766_s19, %s762_s18 }
   0x8   : > { %s978_s26 = smov (%p32_p0, %s30_s26), 0  ;;  %p179_p5 = scmp.eq.s32.totalorder %s590_s25, 1 }
   0x9   : > { %p857_p4 = por %p173_p2, %p172_p1  ;;  %s159_s29 = ssub.s32 %s778_s22, %s978_s26 }
   0xa   : > { %p596_p6 = scmp.ge.s32.totalorder %s782_s23, 1  ;;  %p160_p7 = scmp.eq.s32.totalorder %s159_s29, 0 }
   0xb   : > { %p864_p8 = por %p179_p5, %p178_p3  ;;  %p229_p9 = scmp.lt.s32.totalorder %s782_s23, 3 }
   0xc   : > { %s870_s6 = scalar_select %p160_p7, %s770_s20, %s162_s27  }
   0xd   : > { %p230_p10 = pnand %p596_p6, %p229_p9 }
   0xe   : > { %vm290_vm0 = vcmask (!%p230_p10), 261120   ;;  %v784_v0 = vmov (!%p230_p10), 0.0   ;;  %v698_v1 = vld [vmem:[%s965_s1] sm:$0xff] (!%p230_p10)   ;;  %vm785_vm1 = vmmov (!%p230_p10), 0   ;;  %v699_v4 = vld [vmem:[%s965_s1 + $0x8] sm:$0xff] (!%p230_p10)   ;;  %vm401_vm2 = vcmask (!%p230_p10), 523264  }
   0xf   : > { %233 = sbr.rel (%p230_p10) target bundleno = 504 (0x1f8), region = 40  ;;  %621 = vmatprep.subr.bf16.mxu0 (!%p230_p10), %v784_v0  ;;  %291 = vst.msk [vmem:[#allocation2] sm:$0xff] (!%p230_p10), %vm290_vm0, %v784_v0  ;;  %633 = vmatprep.subr.bf16.mxu1 (!%p230_p10), %v784_v0  ;;  %v333_v2 = vsel (!%p230_p10), %vm290_vm0, %v698_v1, 0  ;;  %v702_v3 = vld [vmem:[%s967_s3] sm:$0xff] (!%p230_p10)   ;;  %v336_v6 = vsel (!%p230_p10), %vm290_vm0, %v699_v4, 0  ;;  %v700_v7 = vld [vmem:[%s965_s1 + $0x10] sm:$0xff] (!%p230_p10)  }
  0x10   : > { %629 = vmatprep.mubr.msk.bf16.mxu0 (!%p230_p10), %vm785_vm1, %v784_v0  ;;  %637 = vmatprep.mubr.msk.bf16.mxu1 (!%p230_p10), %vm785_vm1, %v784_v0  ;;  %v406_v5 = vsel (!%p230_p10), %vm401_vm2, %v702_v3, 0  ;;  %v339_v8 = vsel (!%p230_p10), %vm290_vm0, %v700_v7, 0  ;;  %p268_p11 = scmp.lt.s32.totalorder (!%p230_p10), %s774_s21, 1  ;;  %v701_v9 = vld [vmem:[%s965_s1 + $0x18] sm:$0xff] (!%p230_p10)   ;;  %v703_v12 = vld [vmem:[%s967_s3 + $0x8] sm:$0xff] (!%p230_p10)   ;;  %s265_s11 = sand.u32 (!%p230_p10), 1, %s766_s19  }
  0x11   : > { %622 = vmatpush3.bf16.xpose.msra.mxu0 (!%p230_p10), %v333_v2  ;;  %634 = vmatpush3.bf16.xpose.msra.mxu1 (!%p230_p10), %v406_v5  ;;  %v342_v10 = vsel (!%p230_p10), %vm290_vm0, %v701_v9, 0  ;;  %v409_v13 = vsel (!%p230_p10), %vm401_vm2, %v703_v12, 0  ;;  %v599_v14 = vld [vmem:[%s966_s2] ss:$0 sm:$0xff] (!%p230_p10)  ;;  %s597_s12 = sshll.u32 (!%p230_p10), %s265_s11, 3  ;;  %s610_s15 = sshll.u32 (!%p230_p10), %s774_s21, 7 }
  0x12   : > { %623 = vmatprep.subr.bf16.mxu0 (!%p230_p10), %v784_v0  ;;  %635 = vmatprep.subr.bf16.mxu1 (!%p230_p10), %v784_v0  ;;  %v608_v28 = vld [vmem:[%s968_s4] ss:$0 sm:$0xff] (!%p230_p10)  ;;  %s267_s16 = scalar_lea.vmem (!%p230_p10), [#allocation3], %s597_s12  ;;  %s916_s27 = scalar_lea.hbm (!%p230_p10), %s969_s5, %s610_s15 }
  0x16   : > { %s269_s17 = scalar_select %p268_p11, %s774_s21, 1  ;;  %v385_v22 = vld [vmem:[#allocation2] sm:$0xff] }
  0x17   : > { %s786_s21 = smov [#allocation3]  }
  0x18   : > { %s598_s24 = sshll.u32 %s269_s17, 2  ;;  %s480_s17 = sshll.u32 %s267_s16, 4  ;;  %s918_s17 = int_to_ptr.vmem [resolvable:$true] %s480_s17 }
  0x19   : > { %624 = vmatpush3.bf16.xpose.msra.mxu0 %v336_v6  ;;  %s271_s29 = scalar_lea.vmem %s964_s0, %s598_s24  ;;  %636 = vmatpush3.bf16.xpose.msra.mxu1 %v409_v13  ;;  %s704_s7 = scalar_lea.vmem %s918_s17, 128 }
  0x1a   : > { %625 = vmatprep.subr.bf16.mxu0 %v784_v0  ;;  %v292_v11 = vld [vmem:[%s271_s29] sm:$0xf]  ;;  %s467_s29 = scalar_lea.sflag [#allocation4], %s265_s11  ;;  %p705_p12 = scmp.ne.s32.totalorder %s918_s17, %s704_s7 }
  0x1b   : > { %s708_s8 = sshll.u32 %s786_s21, 4  ;;  %s709_s8 = int_to_ptr.vmem [resolvable:$false] %s708_s8 }
  0x1c   : > { %p706_p13 = pnand %p705_p12, %p857_p4  ;;  %s710_s9 = scalar_lea.vmem %s709_s8, 256 }
  0x1d   : > { %p711_p1 = scmp.lt.s32.totalorder %s918_s17, %s709_s8  ;;  %p712_p2 = scmp.lt.s32.totalorder %s710_s9, %s704_s7 }
  0x1e   : > { %p707_p0 = pneg %p706_p13 }
  0x1f   : > { %p713_p3 = por %p712_p2, %p711_p1 }
  0x21   : > { %626 = vmatpush3.bf16.xpose.msra.mxu0 %v339_v8  ;;  %p714_p5 = pnand %p713_p3, %p707_p0 }
  0x22   : > { %627 = vmatprep.subr.bf16.mxu0 %v784_v0 }
  0x29   : > { %628 = vmatpush3.bf16.xpose.msra.mxu0 %v342_v10 }
  0x30   : > { %630 = vmatmul.mubr.msk.bf16.vlgmr.msra.gmra.mrb[0].mxu0 %vm290_vm0, %v292_v11 }
 0x103   : > { %v378_v15 = vpop.f32.mrb[0].mxu0 }
 0x104   : > { %v379_v16 = vadd.f32 %v599_v14, %v378_v15  ;;  %v631_v17 = vpop.f32.mrb[1].mxu0 }
 0x105   : > { %v381_v18 = vpop.f32.mrb[2].mxu0 }
 0x106   : > { %v384_v19 = vmax.f32 %v379_v16, 0.0  ;;  %v632_v20 = vpop.f32.mrb[3].mxu0 }
 0x108   : > { %v386_v21 = vpack.c.bf16 %v384_v19, %v384_v19 }
 0x10a   : > { %638 = vmatmul.mubr.msk.bf16.vlgmr.msra.gmra.mrb[0].mxu1 %vm401_vm2, %v386_v21 }
 0x1dd   : > { %v445_v23 = vpop.f32.mrb[0].mxu1 }
 0x1de   : > { %v451_v24 = vadd.f32 %v445_v23, %v385_v22  ;;  %v639_v25 = vpop.f32.mrb[1].mxu1 }
 0x1df   : > { %v448_v26 = vpop.f32.mrb[2].mxu1 }
 0x1e0   : > { %452 = vst.msk [vmem:[#allocation2] sm:$0xff] %vm290_vm0, %v451_v24  ;;  %v640_v27 = vpop.f32.mrb[3].mxu1 }
 0x1e7   : > { %v456_v29 = vld [vmem:[#allocation2] sm:$0xff] }
 0x1e8   : > { %v464_v30 = vadd.f32 %v608_v28, %v456_v29 }
 0x1ea   : > { %465 = vst.msk [vmem:[%s267_s16] sm:$0xff] %vm290_vm0, %v464_v30 }
 0x1eb   : > { %717 = shalt.err (!%p714_p5)
}
 0x1ec   : > { %s718_s10 = scalar_lea.hbm %s916_s27, 128  ;;  %s722_s13 = scalar_lea.hbm %s969_s5, 256 }
 0x1ed   : > { %p719_p6 = scmp.ne.s32.totalorder %s916_s27, %s718_s10  ;;  %p723_p10 = scmp.lt.u32.totalorder %s916_s27, %s969_s5 }
 0x1ee   : > { %p724_p11 = scmp.lt.u32.totalorder %s722_s13, %s718_s10  ;;  %p726_p13 = scmp.lt.u32.totalorder %s718_s10, %s916_s27 }
 0x1ef   : > { %p720_p7 = pnand %p719_p6, %p857_p4 }
 0x1f0   : > { %p725_p12 = por %p724_p11, %p723_p10 }
 0x1f1   : > { %p721_p9 = pneg %p720_p7 }
 0x1f2   : > { %p727_p0 = por %p726_p13, %p725_p12 }
 0x1f4   : > { %p728_p1 = pnand %p727_p0, %p721_p9 }
 0x1f6   : > { %731 = shalt.err (!%p728_p1)
}
 0x1f7   : > { %641 = dma.vmem_to_hbm [thread:$0]  (%p857_p4), %s918_s17, 128, %s916_s27, %s467_s29  }
 0x1f8 PF: > { %p647_p2 = scmp.ge.s32.totalorder %s782_s23, 2  ;;  %s492_s16 = sand.u32 1, %s762_s18  }
 0x1f9   : > { %s493_s24 = scalar_lea.sflag [#allocation4], %s492_s16 }
 0x1fa   : > { %p644_p3 = pnand %p647_p2, %p864_p8 }
 0x1fc   : > { %757 = dma.done.wait (!%p644_p3), %s493_s24, 128  }
 0x1fd   : > { %759 = vsyncadd (!%p644_p3), %s493_s24, 4294967168  ;;  %s18_s23 = sadd.s32 1, %s782_s23   ;;  %s972_s18 = smov %s766_s19 }
 0x1fe   : > { %p15_p5 = scmp.ge.s32.totalorder %s18_s23, 4   ;;  %s973_s19 = smov %s770_s20 }
 0x1ff   : > { %s974_s20 = smov %s870_s6  ;;  %s975_s21 = smov %s778_s22 }
 0x200   : > { %s976_s22 = smov %s978_s26  ;;  %17 = sbr.rel (!%p15_p5) target bundleno = 4 (0x4), region = 92 }
 0x207   :  { %498 = vsyncpa [#allocation4], 1 }
 0x208   :  { %500 = vsyncpa [#allocation4 + $0x1], 1 }

</bundles_post_ra>
